<compile_context>
chip_gen: v6e
topology: v6e:2x2x1
jax: 0.10.0
libtpu: 0.0.40
codegen_flags: <defaults>
</compile_context>

<pallas_src>
import functools
import math

import numpy as np
import jax
import jax.numpy as jnp
from jax.experimental import pallas as pl
from jax.experimental.pallas import tpu as pltpu

_FP32_MIN_NORMAL = float(2.0 ** -126)
_LANE = 128


def _cdiv(a, b):
    return -(-a // b)


# --------------------------------------------------------------------------- formats
def _get_format_params(fmt: str):
    """Mirrors microxcaling's _get_format_params for the supported MX element formats."""
    if fmt == "int8":
        ebits, mbits, emax = 0, 8, 0
    elif fmt == "int4":
        ebits, mbits, emax = 0, 4, 0
    elif fmt == "fp8_e5m2":
        ebits, mbits = 5, 4
        emax = 2 ** (ebits - 1) - 1
    elif fmt == "fp8_e4m3":
        ebits, mbits = 4, 5
        emax = 2 ** (ebits - 1)
    elif fmt == "fp4_e2m1":
        ebits, mbits = 2, 3
        emax = 2 ** (ebits - 1)
    else:
        raise ValueError(f"unsupported MX format: {fmt}")
    if fmt == "fp8_e4m3":
        max_norm = 2 ** emax * 1.75
    else:
        max_norm = 2 ** emax * float(2 ** (mbits - 1) - 1) / 2 ** (mbits - 2)
    min_norm = 0.0 if ebits == 0 else 2.0 ** (2 - 2 ** (ebits - 1))
    return ebits, mbits, emax, max_norm, min_norm


# --------------------------------------------------------------------------- roll probe
_ROLL_LOOKAHEAD_POSITIVE = None


def _roll_lookahead_positive():
    """True iff pltpu.roll(x, s, axis)[..., i] == x[..., (i + s) % n].

    Probed once with a tiny kernel so the segmented-max rolls use the correct direction
    regardless of the rotate convention of the underlying lowering.  Result is cached.
    """
    global _ROLL_LOOKAHEAD_POSITIVE
    if _ROLL_LOOKAHEAD_POSITIVE is None:
        def k(x_ref, o_ref):
            o_ref[...] = pltpu.roll(x_ref[...], 1, axis=1)

        x = jnp.broadcast_to(jax.lax.iota(jnp.float32, _LANE), (8, _LANE))
        y = pl.pallas_call(k, out_shape=jax.ShapeDtypeStruct((8, _LANE), jnp.float32))(x)
        _ROLL_LOOKAHEAD_POSITIVE = bool(float(np.asarray(y)[0, 0]) == 1.0)
    return _ROLL_LOOKAHEAD_POSITIVE


# --------------------------------------------------------------------------- kernel
def _mx_quant_kernel(x_ref, o_ref, *, group_size, ebits, mbits, emax, max_norm,
                     scale_ebits, lookahead_positive):
    rt, wt = x_ref.shape
    f32 = jnp.float32

    def look(a, s):   # b[..., i] = a[..., (i + s) % wt]
        return pltpu.roll(a, s if lookahead_positive else wt - s, axis=1)

    def lag(a, s):    # b[..., i] = a[..., (i - s) % wt]
        return pltpu.roll(a, wt - s if lookahead_positive else s, axis=1)

    x = x_ref[...].astype(f32)                          # (rt, wt), lane-dense

    # ---- per-group (group_size consecutive lanes) abs-max, kept lane-dense.
    # Phase 1: log2(G) forward-looking roll+max steps -> every group-START lane holds its
    #          group's max (the 32-wide window starting at a group start never crosses a
    #          group boundary, group boundaries being lane-aligned in the block).
    # Phase 2: zero all non-start lanes (values are >= 0) and max-broadcast the start
    #          value back over the group with log2(G) backward-looking roll+max steps
    #          (the 32-wide window ending at lane i contains exactly one group start).
    # Rolls ride the otherwise-idle XLU; no reshapes, no masked vregs, no relayouts.
    a = jnp.abs(x)
    s = 1
    while s < group_size:
        a = jnp.maximum(a, look(a, s))
        s *= 2
    lane = jax.lax.broadcasted_iota(jnp.int32, (rt, wt), 1)
    a = jnp.where((lane & (group_size - 1)) == 0, a, f32(0.0))
    s = 1
    while s < group_size:
        a = jnp.maximum(a, lag(a, s))
        s *= 2
    amax = a                                            # every lane = its group's abs-max

    # ---- find_params: shared exponent / power-of-two scale (scale_mbits == 0).
    # amax >= 0 so the exponent-field extraction needs no sign masking; amax == 0 or
    # subnormal give e = -127 - emax which the clamp folds to the same outputs as the
    # torch-style reference.
    scale_emax = 2 ** (scale_ebits - 1) - 1
    e = (pltpu.bitcast(amax, jnp.int32) >> 23) - (127 + emax)
    shared_i = jnp.maximum(e, -scale_emax)
    overflow = shared_i > scale_emax
    shared_exp = jnp.where(overflow, scale_emax + 1, shared_i).astype(f32)
    scale = jnp.exp2(shared_exp)                        # exact power of two (inf on overflow)
    # scales are exact powers of two -> x / scale == x * 2**(-shared_exp) (exact);
    # mimic x / inf on overflow with an explicit zero so NaN-poisoning matches torch.
    inv_scale = jnp.where(overflow, f32(0.0), jnp.exp2(-shared_exp))

    # ---- fake_quantize: x / s -> element-wise quantize -> * s   (zero_point == 0)
    xs = x * inv_scale
    if ebits != 0:
        min_exp = -(2 ** (ebits - 1)) + 2
        pe = ((pltpu.bitcast(xs, jnp.int32) >> 23) & 0xFF) - 127
        pexp = jnp.maximum(pe, min_exp).astype(f32)
        up_scale = jnp.exp2(f32(mbits - 2) - pexp)      # _safe_lshift
        down_scale = jnp.exp2(pexp - f32(mbits - 2))    # _safe_rshift
    else:
        # int element formats: pexp == 0 -> compile-time-constant shift factors.
        up_scale = f32(2.0 ** (mbits - 2))
        down_scale = f32(2.0 ** (2 - mbits))
    up = xs * up_scale
    # round='nearest': floor(|up| + 0.5) with the sign re-attached via a sign-bit OR
    # (cheaper on the VALU than jnp.sign * floor).
    mag = jnp.floor(jnp.abs(up) + f32(0.5))
    sign_bits = pltpu.bitcast(up, jnp.int32) & np.int32(-2 ** 31)
    up = pltpu.bitcast(pltpu.bitcast(mag, jnp.int32) | sign_bits, f32)
    q = up * down_scale
    q = jnp.clip(q, -f32(max_norm), f32(max_norm))      # saturate_normals
    q = jnp.where(jnp.isinf(xs), xs, q)                 # propagate +-Inf
    o_ref[...] = (q * scale).astype(o_ref.dtype)


# --------------------------------------------------------------------------- tiling
def _hw_defaults():
    """(target_block_bytes, vmem_limit_bytes) sized for this generation's VMEM."""
    try:
        cap = int(pltpu.get_tpu_info().vmem_capacity_bytes)
    except Exception:
        cap = 64 * 1024 * 1024                          # unknown -> assume small VMEM
    if cap <= 96 * 1024 * 1024:                         # v7x-class: 64 MiB per TensorCore
        return 1 * 1024 * 1024, 28 * 1024 * 1024
    return 2 * 1024 * 1024, 48 * 1024 * 1024            # v5e / v6e: 128 MiB


def _choose_tiles(rows, w_pad, group_size, itemsize, *, target_block_bytes):
    galign = group_size * _LANE // math.gcd(group_size, _LANE)
    sub = 8 * max(1, 4 // itemsize)                     # min sublane tile: 8/16/32

    # Width tile: lane-dense, group/lane aligned, ~2048 lanes.  The trailing width block
    # may be partial; block boundaries stay group aligned so OOB lanes only ever land in
    # fully-discarded groups.
    w_tile = min(galign * max(1, 2048 // galign), w_pad)
    grid_w = _cdiv(w_pad, w_tile)

    # Row tile: fill ~target_block_bytes per input block, multiple of `sub` (or the full
    # row extent for short tensors).
    row_tile = max(sub, (target_block_bytes // (itemsize * w_tile)) // sub * sub)
    row_tile = min(row_tile, rows)
    # Keep enough grid steps to feed the DMA pipeline / both v7x TensorCores ...
    while row_tile > 2 * sub and _cdiv(rows, row_tile) * grid_w < 8:
        row_tile = max(sub, (row_tile // 2) // sub * sub)
    # ... and prefer an even parallel-step total so 2-TC parts split the tail evenly.
    if (_cdiv(rows, row_tile) * grid_w) % 2 == 1:
        half = max(sub, (row_tile // 2) // sub * sub)
        if half < row_tile and (_cdiv(rows, half) * grid_w) % 2 == 0:
            row_tile = half
    return row_tile, w_tile


# --------------------------------------------------------------------------- wrapper
def mx_quantize(x, fmt="fp4_e2m1", group_size=32, scale_ebits=8,
                target_block_bytes=None, donate=False):
    """Pallas implementation of MXQuantizer.forward (zero_point=False, axes=-1)."""
    # TODO(synk): zero_point=True (asymmetric), scale_mbits>0 (shared mantissa), axes=-2
    #             (column-wise) and non-power-of-two group sizes are not implemented;
    #             module defaults (zero_point=False, scale_mbits=0, axes=-1, 32) covered.
    if group_size < 1 or (group_size & (group_size - 1)) != 0:
        raise NotImplementedError("mx_quantize requires a power-of-two group_size")
    ebits, mbits, emax, max_norm, _ = _get_format_params(fmt)
    orig_shape = x.shape
    orig_dtype = x.dtype
    w = orig_shape[-1]
    rows = int(np.prod(orig_shape[:-1], dtype=np.int64)) if len(orig_shape) > 1 else 1
    x2 = x.reshape(rows, w)

    galign = group_size * _LANE // math.gcd(group_size, _LANE)
    if w % galign == 0:
        w_pad = w                                       # aligned: no wrapper-side copy
    else:
        w_pad = galign * _cdiv(w, galign)               # zero-pad only the last dim
        x2 = jnp.pad(x2, ((0, 0), (0, w_pad - w)))

    default_block, vmem_limit = _hw_defaults()
    if target_block_bytes is None:
        target_block_bytes = default_block
    itemsize = jnp.dtype(orig_dtype).itemsize
    row_tile, w_tile = _choose_tiles(rows, w_pad, group_size, itemsize,
                                     target_block_bytes=target_block_bytes)
    grid = (_cdiv(rows, row_tile), _cdiv(w_pad, w_tile))

    kernel = functools.partial(
        _mx_quant_kernel, group_size=group_size, ebits=ebits, mbits=mbits, emax=emax,
        max_norm=max_norm, scale_ebits=scale_ebits,
        lookahead_positive=_roll_lookahead_positive())

    out = pl.pallas_call(
        kernel,
        out_shape=jax.ShapeDtypeStruct((rows, w_pad), orig_dtype),
        grid=grid,
        in_specs=[pl.BlockSpec((row_tile, w_tile), lambda i, j: (i, j))],
        out_specs=pl.BlockSpec((row_tile, w_tile), lambda i, j: (i, j)),
        input_output_aliases=({0: 0} if (donate and w_pad == w) else {}),
        compiler_params=pltpu.CompilerParams(
            dimension_semantics=("parallel", "parallel"),
            vmem_limit_bytes=vmem_limit),
    )(x2)

    if w_pad != w:
        out = out[:, :w]
    return out.reshape(orig_shape)


# --------------------------------------------------------------------------- pure-JAX reference
def mx_quantize_ref(x, fmt="fp4_e2m1", group_size=32, scale_ebits=8):
    """Faithful (torch-style) reference: pad to group multiple, divide by scales."""
    ebits, mbits, emax, max_norm, _ = _get_format_params(fmt)
    orig_shape = x.shape
    w = orig_shape[-1]
    x2 = x.reshape(-1, w).astype(jnp.float32)
    w_pad = -(-w // group_size) * group_size
    x3 = jnp.pad(x2, ((0, 0), (0, w_pad - w))).reshape(
        x2.shape[0], w_pad // group_size, group_size)

    def floor_log2(a):
        bits = jax.lax.bitcast_convert_type(a, jnp.int32)
        return (((bits >> 23) & 0xFF) - 127).astype(jnp.float32)

    amax = jnp.max(jnp.abs(x3), axis=-1, keepdims=True)
    amax = amax + jnp.float32(_FP32_MIN_NORMAL) * (amax == 0).astype(jnp.float32)
    shared_exp = floor_log2(amax) - float(emax)
    scale_emax = float(2 ** (scale_ebits - 1) - 1)
    shared_exp = jnp.where(shared_exp > scale_emax, scale_emax + 1.0, shared_exp)
    shared_exp = jnp.where(shared_exp < -scale_emax, -scale_emax, shared_exp)
    scales = jnp.exp2(shared_exp)

    xs = x3 / scales
    if ebits != 0:
        pexp = floor_log2(jnp.abs(xs) + (xs == 0).astype(jnp.float32))
        pexp = jnp.maximum(pexp, float(-(2 ** (ebits - 1)) + 2))
    else:
        pexp = jnp.zeros_like(xs)
    up = xs * jnp.exp2(jnp.float32(mbits - 2) - pexp)
    up = jnp.sign(up) * jnp.floor(jnp.abs(up) + 0.5)
    q = up * jnp.exp2(pexp - jnp.float32(mbits - 2))
    q = jnp.clip(q, -float(max_norm), float(max_norm))
    q = jnp.where(jnp.isinf(xs), xs, q)
    q = (q * scales).astype(x.dtype)
    return q.reshape(x2.shape[0], w_pad)[:, :w].reshape(orig_shape)


# --------------------------------------------------------------------------- main
if __name__ == "__main__":
    key = jax.random.PRNGKey(0)
    ks = jax.random.split(key, 6)

    def check(x, fmt, **kw):
        out = jax.block_until_ready(mx_quantize(x, fmt=fmt, **kw))
        ref = jax.block_until_ready(mx_quantize_ref(x, fmt=fmt))
        assert out.shape == x.shape and out.dtype == x.dtype
        np.testing.assert_allclose(np.asarray(out, dtype=np.float32),
                                   np.asarray(ref, dtype=np.float32),
                                   rtol=1e-6, atol=1e-6)

    # NCHW conv-style activation; row-wise MX-FP4 in groups of 32 along W (W=16
    # exercises the pad-to-group/lane-alignment ragged-width path).
    check(jax.random.normal(ks[0], (2, 4, 16, 16), dtype=jnp.float32), "fp4_e2m1")
    # Group-aligned but not 128-aligned width + partial trailing ROW block (the small
    # target_block_bytes forces a multi-step row grid).
    check(jax.random.normal(ks[1], (3, 40, 96), dtype=jnp.float32), "fp4_e2m1",
          target_block_bytes=16 * 1024)
    # Fully aligned width, fp8 element format (no wrapper pad/slice path).
    check(jax.random.normal(ks[2], (16, 256), dtype=jnp.float32), "fp8_e4m3")
    # Wide rows: partial trailing WIDTH block (w_tile = 2048 < padded width 2304).
    check(jax.random.normal(ks[3], (2, 8, 2304), dtype=jnp.float32), "fp4_e2m1")
    # Narrow-dtype I/O path (native bf16 DMA, (16,128) tile alignment).
    check(jax.random.normal(ks[4], (2, 16, 256), dtype=jnp.bfloat16), "fp8_e5m2")
    # Integer element format (ebits == 0 constant-shift path).
    check(jax.random.normal(ks[5], (8, 64), dtype=jnp.float32), "int8")

    print("KERNEL_OK")
</pallas_src>

<mosaic_0001>
module attributes {stable_mosaic.version = 11 : i64} {
  func.func @k(%arg0: memref<8x128xf32, #tpu.memory_space<vmem>>, %arg1: memref<8x128xf32, #tpu.memory_space<vmem>>) attributes {dimension_semantics = [], scalar_prefetch = 0 : i64, scratch_operands = 0 : i64, tpu.core_type = #tpu.core_type<tc>} {
    %c0 = arith.constant 0 : index
    %c0_0 = arith.constant 0 : index
    %0 = vector.load %arg0[%c0, %c0_0] : memref<8x128xf32, #tpu.memory_space<vmem>>, vector<8x128xf32>
    %c1_i32 = arith.constant 1 : i32
    %1 = tpu.dynamic_rotate %0 by %c1_i32 dim 1 : vector<8x128xf32>, i32 -> vector<8x128xf32>
    %c0_1 = arith.constant 0 : index
    %c0_2 = arith.constant 0 : index
    %2 = vector.load %arg1[%c0_1, %c0_2] : memref<8x128xf32, #tpu.memory_space<vmem>>, vector<8x128xf32>
    tpu.vector_store %arg1[%c0_1, %c0_2], %1 {strides = array<i32>} : memref<8x128xf32, #tpu.memory_space<vmem>>, vector<8x128xf32>,
    return
  }
}

</mosaic_0001>

<bundles_post_ra>
// kernel: tpu_custom_call.1
= control target key start
LH: loop header
LB: loop body
LE: loop exit
PB: predicated region body
PF: predicated region fallthrough
CT: control target
= control target key end

     0   :  { %6 = vsyncpa [#allocation3], 0  ;;  %s106_s0 = inlined_call_operand.hbm [shape: f32[8,128], index: 0, kind: input, shape index: {}]   ;;  %s107_s1 = inlined_call_operand.hbm [shape: f32[8,128], index: 1, kind: output, shape index: {}]  }
   0x1   :  { %7 = vsyncpa [#allocation4], 0  ;;  %s87_s6 = smov [#allocation2]  }
   0x2   :  { %s14_s7 = sshll.u32 %s87_s6, 4  ;;  %s15_s7 = int_to_ptr.vmem [resolvable:$true] %s14_s7 }
   0x3   :  { %s51_s8 = scalar_lea.vmem %s15_s7, 128  ;;  %p56_p1 = scmp.lt.s32.totalorder %s15_s7, %s15_s7 }
   0x4   :  { %p52_p0 = scmp.ne.s32.totalorder %s15_s7, %s51_s8  ;;  %p57_p2 = scmp.lt.s32.totalorder %s51_s8, %s51_s8 }
   0x6   :  { %p58_p3 = por %p57_p2, %p56_p1 }
   0x8   :  { %p59_p4 = pnand %p58_p3, %p52_p0 }
   0xa   :  { %62 = shalt.err (!%p59_p4)
}
   0xb   :  { %17 = dma.hbm_to_vmem [thread:$0]  %s106_s0, 128, %s15_s7, [#allocation3]  }
   0xc   :  { %83 = dma.done.wait [#allocation3], 128  }
   0xd   :  { %84 = vsyncadd [#allocation3], 4294967168  ;;  %v21_v0 = vld [vmem:[#allocation2] sm:$0xff]  ;;  %s88_s11 = smov 1   ;;  %s89_s12 = smov [#allocation5]  }
   0xe   :  { %22 = vrot.lane.b32.xlu0 %v21_v0, %s88_s11  ;;  %s31_s13 = sshll.u32 %s89_s12, 4  ;;  %s32_s13 = int_to_ptr.vmem [resolvable:$true] %s31_s13 }
   0xf   :  { %s63_s14 = scalar_lea.vmem %s32_s13, 128  ;;  %p68_p6 = scmp.lt.s32.totalorder %s32_s13, %s32_s13 }
  0x10   :  { %p64_p5 = scmp.ne.s32.totalorder %s32_s13, %s63_s14  ;;  %p69_p7 = scmp.lt.s32.totalorder %s63_s14, %s63_s14 }
  0x12   :  { %p70_p8 = por %p69_p7, %p68_p6 }
  0x14   :  { %p71_p9 = pnand %p70_p8, %p64_p5 }
  0x80   :  { %v23_v1 = vpop.permute.xlu0 %22 }
  0x81   :  { %24 = vst [vmem:[#allocation5] sm:$0xff] %v23_v1 }
  0x82   :  { %74 = shalt.err (!%p71_p9)
}
  0x83   :  { %34 = dma.vmem_to_hbm [thread:$0]  %s32_s13, 128, %s107_s1, [#allocation4]  }
  0x84   :  { %85 = dma.done.wait [#allocation4], 128  }
  0x85   :  { %86 = vsyncadd [#allocation4], 4294967168 }
  0x86   :  { %38 = vsyncpa [#allocation3], 1 }
  0x87   :  { %39 = vsyncpa [#allocation4], 1 }

</bundles_post_ra>
